<compile_context>
chip_gen: v6e
topology: v6e:2x2x1
jax: 0.10.0
libtpu: 0.0.40
codegen_flags: <defaults>
</compile_context>

<pallas_src>
import jax
import jax.numpy as jnp
from jax.experimental import pallas as pl
from jax.experimental.pallas import tpu as pltpu


def _round_up(x, m):
    return ((x + m - 1) // m) * m


def _pad8(n):
    return _round_up(max(int(n), 1), 8)


# ---------------------------------------------------------------------------
# Pallas kernel: masked per-pixel MLP, pixels on the lane axis,
# Bb batch elements per grid step (statically unrolled).
# ---------------------------------------------------------------------------
def _neural_encoder_kernel(x_ref, m_ref, w1t_ref, b1_ref, w2t_ref, b2_ref, o_ref):
    # x_ref  : (Bb, C,  tn)  pixel tile (channels on sublanes, pixels on lanes)
    # m_ref  : (Bb, Mc, tn)  un-broadcast mask tile (Mc == 1 or C)
    # w1t_ref: (Hd, C)       first-layer weight, transposed (resident)
    # b1_ref : (Hd, 1)       f32
    # w2t_ref: (Co, Hd)      second-layer weight, transposed (resident)
    # b2_ref : (Co, 1)       f32
    # o_ref  : (Bb, Co, tn)  lane-dense output tile
    w1t = w1t_ref[...]
    b1 = b1_ref[...]
    w2t = w2t_ref[...]
    b2 = b2_ref[...]
    bb = x_ref.shape[0]
    # Static unroll over the batch block (Bb is small); each iteration is a
    # plain 2-D MXU matmul path with f32 accumulation.
    # TODO(synk): if bundle dumps show the degenerate (K=C=4) MXU path binding
    # at large tn, replace the first dot with an unrolled VPU broadcast-FMA.
    for i in range(bb):
        xm = x_ref[i] * m_ref[i]                       # mask broadcast in-kernel
        h = jnp.dot(w1t, xm, preferred_element_type=jnp.float32)
        # NOTE: tanh-approx GELU (jax.nn.gelu default); PyTorch nn.GELU()
        # defaults to exact erf -- deviates ~1e-3.  Kept for lowering safety.
        h = jax.nn.gelu(h + b1, approximate=True)
        h = h.astype(w2t.dtype)
        out = jnp.dot(w2t, h, preferred_element_type=jnp.float32) + b2
        o_ref[i] = out.astype(o_ref.dtype)


# ---------------------------------------------------------------------------
# Tile / batch-block planning
# ---------------------------------------------------------------------------
def _plan(b, hw, c, mc, co, *, tn_max, bb_max,
          vmem_budget_bytes=12 * 1024 * 1024, itemsize=4):
    """Pick (tn, hw_blocks, bb).

    - tn = hw (full-extent lane dim, no pad needed) when it fits one tile,
      otherwise a multiple-of-128 tile; the ragged last block is masked by
      Pallas (safe: the op is per-pixel).
    - bb = largest divisor of b (<= bb_max) that keeps >=2 parallel grid steps
      whenever possible (v7x megacore) and stays inside the VMEM budget
      (budget chosen to fit v5e's 16 MiB default scoped VMEM).
    """
    tn_max = max(128, _round_up(tn_max, 128))
    hw128 = _round_up(hw, 128)
    if hw128 <= tn_max:
        tn = hw                       # full-extent block: no pad, no slice
    else:
        tn = tn_max                   # multiple of 128; ragged last block OK
    hw_blocks = pl.cdiv(hw, tn)

    # Double-buffered per-batch-element VMEM bytes (x + mask + out tiles);
    # resident weights are negligible at these channel counts.
    per_be = 2 * (_pad8(c) + _pad8(mc) + _pad8(co)) * tn * itemsize
    min_steps = min(2, b * hw_blocks)

    bb = 1
    for d in range(min(b, bb_max), 0, -1):
        if b % d != 0:
            continue
        if (b // d) * hw_blocks < min_steps:
            continue
        if d * per_be > vmem_budget_bytes:
            continue
        bb = d
        break
    return tn, hw_blocks, bb


# ---------------------------------------------------------------------------
# pallas_call wrapper
# ---------------------------------------------------------------------------
def _masked_mlp_pallas(x3, m3, w1t, b1, w2t, b2, *, out_dtype,
                       tn_max=8192, bb_max=8):
    """x3: [B, C, HW]; m3: [B, Mc, HW] (Mc in {1, C}). Returns [B, Cout, HW]."""
    b, c, hw = x3.shape
    mc = m3.shape[1]
    hd = w1t.shape[0]
    co = w2t.shape[0]

    itemsize = max(jnp.dtype(x3.dtype).itemsize, jnp.dtype(out_dtype).itemsize)
    tn, hw_blocks, bb = _plan(b, hw, c, mc, co,
                              tn_max=tn_max, bb_max=bb_max, itemsize=itemsize)
    grid = (b // bb, hw_blocks)

    out = pl.pallas_call(
        _neural_encoder_kernel,
        out_shape=jax.ShapeDtypeStruct((b, co, hw), out_dtype),
        grid_spec=pltpu.PrefetchScalarGridSpec(
            num_scalar_prefetch=0,
            grid=grid,
            in_specs=[
                pl.BlockSpec((bb, c, tn), lambda i, j: (i, 0, j)),    # x tile
                pl.BlockSpec((bb, mc, tn), lambda i, j: (i, 0, j)),   # mask tile
                # Weights / biases: constant index map -> resident across grid.
                # TODO(synk): pipeline_mode=pl.Buffered(1) would drop the spare
                # double-buffer copy of these constants; kept at default
                # buffering for lowering compatibility (VMEM cost is negligible
                # at these sizes and well inside the budget used in _plan).
                pl.BlockSpec((hd, c), lambda i, j: (0, 0)),           # W1^T
                pl.BlockSpec((hd, 1), lambda i, j: (0, 0)),           # b1
                pl.BlockSpec((co, hd), lambda i, j: (0, 0)),          # W2^T
                pl.BlockSpec((co, 1), lambda i, j: (0, 0)),           # b2
            ],
            out_specs=pl.BlockSpec((bb, co, tn), lambda i, j: (i, 0, j)),
        ),
        compiler_params=pltpu.CompilerParams(
            dimension_semantics=("parallel", "parallel"),
        ),
    )(x3, m3, w1t, b1, w2t, b2)
    return out


# ---------------------------------------------------------------------------
# NeuralEncoder wrapper (matches the PyTorch forward semantics)
# ---------------------------------------------------------------------------
class NeuralEncoder:
    """encoded = physical_encoder(x, mask); return network(encoded, mask)."""

    def __init__(self, params, physical_encoder=None, out_dtype=None,
                 tn_max=8192, bb_max=8):
        self.out_dtype = out_dtype      # None -> inherit x.dtype
        self.tn_max = tn_max
        self.bb_max = bb_max
        if physical_encoder is None:
            # Default branch of the PyTorch module: identity on x, mask ignored.
            self.physical_encoder = lambda x, mask: x
        else:
            self.physical_encoder = physical_encoder

        # Weight prep hoisted here (done once, not per forward): transpose the
        # tiny weights so the kernel runs pixels-on-lanes; biases as columns.
        w1 = jnp.asarray(params["w1"])                      # (C, hidden)
        w2 = jnp.asarray(params["w2"])                      # (hidden, Cout)
        self.w1t = w1.T                                     # (hidden, C)
        self.w2t = w2.T                                     # (Cout, hidden)
        self.b1c = jnp.asarray(params["b1"]).reshape(-1, 1).astype(jnp.float32)
        self.b2c = jnp.asarray(params["b2"]).reshape(-1, 1).astype(jnp.float32)
        self.c_out = self.w2t.shape[0]

    def __call__(self, in_tensor, mask):
        encoded = self.physical_encoder(in_tensor, mask)
        return self._network(encoded, mask)

    def _network(self, x, mask):
        # x: NCHW [B, C, H, W]; mask: [B, 1, H, W] (or [B, C, H, W]).
        b, c, h, w = x.shape
        hw = h * w
        out_dtype = self.out_dtype if self.out_dtype is not None else x.dtype

        # NCHW is already channels-major: reshape only, no transpose, NO cast
        # (a wrapper-side cast would be an extra full HBM pass; the kernel
        # consumes x/mask in whatever dtype the producer supplies).
        x3 = x.reshape(b, c, hw)
        m3 = mask.reshape(b, mask.shape[1], hw)

        out3 = _masked_mlp_pallas(x3, m3, self.w1t, self.b1c, self.w2t, self.b2c,
                                  out_dtype=out_dtype,
                                  tn_max=self.tn_max, bb_max=self.bb_max)
        return out3.reshape(b, self.c_out, h, w)


def make_params(key, c_in, hidden, c_out, dtype=jnp.float32):
    k1, k2 = jax.random.split(key)
    scale1 = 1.0 / jnp.sqrt(c_in)
    scale2 = 1.0 / jnp.sqrt(hidden)
    return {
        "w1": (jax.random.normal(k1, (c_in, hidden), dtype) * scale1),
        "b1": jnp.zeros((1, hidden), dtype),
        "w2": (jax.random.normal(k2, (hidden, c_out), dtype) * scale2),
        "b2": jnp.zeros((1, c_out), dtype),
    }


if __name__ == "__main__":
    key = jax.random.PRNGKey(0)
    kx, km, kp = jax.random.split(key, 3)

    B, C, H, W = 2, 4, 16, 16
    HIDDEN, C_OUT = 32, 4

    x = jax.random.normal(kx, (B, C, H, W), jnp.float32)
    mask = (jax.random.uniform(km, (B, 1, H, W)) > 0.3).astype(jnp.float32)

    params = make_params(kp, C, HIDDEN, C_OUT)

    # ---- f32 path (no wrapper casts, no pad, no output slice) --------------
    encoder = NeuralEncoder(params)  # physical_encoder=None -> identity
    out = encoder(x, mask)
    jax.block_until_ready(out)

    # Pure-JAX reference of the same forward (same tanh-approx GELU).
    mask_b = jnp.broadcast_to(mask, x.shape)
    xm = jnp.transpose(x * mask_b, (0, 2, 3, 1)).reshape(-1, C)
    ref = jax.nn.gelu(xm @ params["w1"] + params["b1"]) @ params["w2"] + params["b2"]
    ref = jnp.transpose(ref.reshape(B, H, W, C_OUT), (0, 3, 1, 2))

    assert out.shape == (B, C_OUT, H, W)
    assert jnp.allclose(out, ref, atol=1e-5, rtol=1e-5)

    # ---- bf16-producer path (v6e/v7x): inputs already bf16, bf16 output ----
    # The cast happens at the (simulated) producer, not inside the wrapper.
    x_bf16 = x.astype(jnp.bfloat16)
    mask_bf16 = mask.astype(jnp.bfloat16)
    encoder_bf16 = NeuralEncoder(params, out_dtype=jnp.bfloat16)
    out_bf16 = encoder_bf16(x_bf16, mask_bf16)
    jax.block_until_ready(out_bf16)
    assert out_bf16.shape == (B, C_OUT, H, W)
    assert out_bf16.dtype == jnp.bfloat16
    assert jnp.allclose(out_bf16.astype(jnp.float32), ref, atol=5e-2, rtol=5e-2)

    print("KERNEL_OK")
</pallas_src>

<mosaic_0001>
module attributes {stable_mosaic.version = 11 : i64} {
  func.func @_neural_encoder_kernel(%arg0: i32, %arg1: i32, %arg2: memref<1x4x256xf32, #tpu.memory_space<vmem>>, %arg3: memref<1x1x256xf32, #tpu.memory_space<vmem>>, %arg4: memref<32x4xf32, #tpu.memory_space<vmem>>, %arg5: memref<32x1xf32, #tpu.memory_space<vmem>>, %arg6: memref<4x32xf32, #tpu.memory_space<vmem>>, %arg7: memref<4x1xf32, #tpu.memory_space<vmem>>, %arg8: memref<1x4x256xf32, #tpu.memory_space<vmem>>) attributes {dimension_semantics = [#tpu.dimension_semantics<parallel>, #tpu.dimension_semantics<parallel>], iteration_bounds = array<i64: 2, 1>, scalar_prefetch = 0 : i64, scratch_operands = 0 : i64, tpu.core_type = #tpu.core_type<tc>, window_params = [{transform_indices = @transform_0, window_bounds = array<i64: 1, 4, 256>}, {transform_indices = @transform_1, window_bounds = array<i64: 1, 1, 256>}, {pipeline_mode = #tpu.pipeline_mode<synchronous>, transform_indices = @transform_2, window_bounds = array<i64: 32, 4>}, {pipeline_mode = #tpu.pipeline_mode<synchronous>, transform_indices = @transform_3, window_bounds = array<i64: 32, 1>}, {pipeline_mode = #tpu.pipeline_mode<synchronous>, transform_indices = @transform_4, window_bounds = array<i64: 4, 32>}, {pipeline_mode = #tpu.pipeline_mode<synchronous>, transform_indices = @transform_5, window_bounds = array<i64: 4, 1>}, {transform_indices = @transform_6, window_bounds = array<i64: 1, 4, 256>}]} {
    %c0 = arith.constant 0 : index
    %c0_0 = arith.constant 0 : index
    %0 = vector.load %arg4[%c0, %c0_0] : memref<32x4xf32, #tpu.memory_space<vmem>>, vector<32x4xf32>
    %c0_1 = arith.constant 0 : index
    %c0_2 = arith.constant 0 : index
    %1 = vector.load %arg5[%c0_1, %c0_2] : memref<32x1xf32, #tpu.memory_space<vmem>>, vector<32x1xf32>
    %c0_3 = arith.constant 0 : index
    %c0_4 = arith.constant 0 : index
    %2 = vector.load %arg6[%c0_3, %c0_4] : memref<4x32xf32, #tpu.memory_space<vmem>>, vector<4x32xf32>
    %c0_5 = arith.constant 0 : index
    %c0_6 = arith.constant 0 : index
    %3 = vector.load %arg7[%c0_5, %c0_6] : memref<4x1xf32, #tpu.memory_space<vmem>>, vector<4x1xf32>
    %c0_7 = arith.constant 0 : index
    %c0_8 = arith.constant 0 : index
    %c0_9 = arith.constant 0 : index
    %4 = vector.load %arg2[%c0_7, %c0_8, %c0_9] : memref<1x4x256xf32, #tpu.memory_space<vmem>>, vector<1x4x256xf32>
    %5 = vector.shape_cast %4 : vector<1x4x256xf32> to vector<4x256xf32>
    %c0_10 = arith.constant 0 : index
    %c0_11 = arith.constant 0 : index
    %c0_12 = arith.constant 0 : index
    %6 = vector.load %arg3[%c0_10, %c0_11, %c0_12] : memref<1x1x256xf32, #tpu.memory_space<vmem>>, vector<1x1x256xf32>
    %7 = vector.shape_cast %6 : vector<1x1x256xf32> to vector<1x256xf32>
    %8 = vector.broadcast %7 : vector<1x256xf32> to vector<4x256xf32>
    %9 = arith.mulf %5, %8 : vector<4x256xf32>
    %cst = arith.constant dense<0.000000e+00> : vector<32x256xf32>
    %10 = tpu.matmul %0, %9, %cst {dimension_numbers = #tpu.dot_dimension_numbers<[1], [0], [0], [1], [0, 0, 1, 1], [], []>} : vector<32x4xf32>, vector<4x256xf32>, vector<32x256xf32> -> vector<32x256xf32>
    %11 = vector.broadcast %1 : vector<32x1xf32> to vector<32x256xf32>
    %12 = arith.addf %10, %11 : vector<32x256xf32>
    %13 = arith.mulf %12, %12 : vector<32x256xf32>
    %14 = arith.mulf %12, %13 : vector<32x256xf32>
    %cst_13 = arith.constant 4.471500e-02 : f32
    %15 = vector.broadcast %cst_13 : f32 to vector<32x256xf32>
    %16 = arith.mulf %15, %14 : vector<32x256xf32>
    %17 = arith.addf %12, %16 : vector<32x256xf32>
    %cst_14 = arith.constant 0.797884583 : f32
    %18 = vector.broadcast %cst_14 : f32 to vector<32x256xf32>
    %19 = arith.mulf %18, %17 : vector<32x256xf32>
    %20 = math.tanh %19 : vector<32x256xf32>
    %cst_15 = arith.constant 1.000000e+00 : f32
    %21 = vector.broadcast %cst_15 : f32 to vector<32x256xf32>
    %22 = arith.addf %21, %20 : vector<32x256xf32>
    %cst_16 = arith.constant 5.000000e-01 : f32
    %23 = vector.broadcast %cst_16 : f32 to vector<32x256xf32>
    %24 = arith.mulf %23, %22 : vector<32x256xf32>
    %25 = arith.mulf %12, %24 : vector<32x256xf32>
    %cst_17 = arith.constant dense<0.000000e+00> : vector<4x256xf32>
    %26 = tpu.matmul %2, %25, %cst_17 {dimension_numbers = #tpu.dot_dimension_numbers<[1], [0], [0], [1], [0, 0, 1, 1], [], []>} : vector<4x32xf32>, vector<32x256xf32>, vector<4x256xf32> -> vector<4x256xf32>
    %27 = vector.broadcast %3 : vector<4x1xf32> to vector<4x256xf32>
    %28 = arith.addf %26, %27 : vector<4x256xf32>
    %c0_18 = arith.constant 0 : index
    %c0_19 = arith.constant 0 : index
    %c0_20 = arith.constant 0 : index
    %29 = vector.load %arg8[%c0_18, %c0_19, %c0_20] : memref<1x4x256xf32, #tpu.memory_space<vmem>>, vector<1x4x256xf32>
    %30 = vector.shape_cast %29 : vector<1x4x256xf32> to vector<4x256xf32>
    %31 = vector.shape_cast %28 : vector<4x256xf32> to vector<1x4x256xf32>
    tpu.vector_store %arg8[%c0_18, %c0_19, %c0_20], %31 {strides = array<i32>} : memref<1x4x256xf32, #tpu.memory_space<vmem>>, vector<1x4x256xf32>,
    return
  }
  func.func @transform_0(%arg0: i32, %arg1: i32) -> (i32, i32, i32) {
    %c0_i32 = arith.constant 0 : i32
    %c0_i32_0 = arith.constant 0 : i32
    return %arg0, %c0_i32, %arg1 : i32, i32, i32
  }
  func.func @transform_1(%arg0: i32, %arg1: i32) -> (i32, i32, i32) {
    %c0_i32 = arith.constant 0 : i32
    %c0_i32_0 = arith.constant 0 : i32
    return %arg0, %c0_i32, %arg1 : i32, i32, i32
  }
  func.func @transform_2(%arg0: i32, %arg1: i32) -> (i32, i32) {
    %c0_i32 = arith.constant 0 : i32
    %c0_i32_0 = arith.constant 0 : i32
    %c0_i32_1 = arith.constant 0 : i32
    return %c0_i32, %c0_i32_0 : i32, i32
  }
  func.func @transform_3(%arg0: i32, %arg1: i32) -> (i32, i32) {
    %c0_i32 = arith.constant 0 : i32
    %c0_i32_0 = arith.constant 0 : i32
    %c0_i32_1 = arith.constant 0 : i32
    return %c0_i32, %c0_i32_0 : i32, i32
  }
  func.func @transform_4(%arg0: i32, %arg1: i32) -> (i32, i32) {
    %c0_i32 = arith.constant 0 : i32
    %c0_i32_0 = arith.constant 0 : i32
    %c0_i32_1 = arith.constant 0 : i32
    return %c0_i32, %c0_i32_0 : i32, i32
  }
  func.func @transform_5(%arg0: i32, %arg1: i32) -> (i32, i32) {
    %c0_i32 = arith.constant 0 : i32
    %c0_i32_0 = arith.constant 0 : i32
    %c0_i32_1 = arith.constant 0 : i32
    return %c0_i32, %c0_i32_0 : i32, i32
  }
  func.func @transform_6(%arg0: i32, %arg1: i32) -> (i32, i32, i32) {
    %c0_i32 = arith.constant 0 : i32
    %c0_i32_0 = arith.constant 0 : i32
    return %arg0, %c0_i32, %arg1 : i32, i32, i32
  }
}

</mosaic_0001>

<bundles_post_ra>
// kernel: tpu_custom_call.1
= control target key start
LH: loop header
LB: loop body
LE: loop exit
PB: predicated region body
PF: predicated region fallthrough
CT: control target
= control target key end

     0   :  { %11 = vsyncpa [#allocation3], 0  ;;  %s1120_s0 = inlined_call_operand.vmem [shape: f32[2,4,256], index: 0, kind: input, shape index: {}]   ;;  %s1121_s1 = inlined_call_operand.vmem [shape: f32[2,1,256], index: 1, kind: input, shape index: {}]   ;;  %s1122_s2 = inlined_call_operand.vmem [shape: f32[32,4], index: 2, kind: input, shape index: {}]   ;;  %s1123_s3 = inlined_call_operand.vmem [shape: f32[32,1], index: 3, kind: input, shape index: {}]   ;;  %s1124_s4 = inlined_call_operand.vmem [shape: f32[4,32], index: 4, kind: input, shape index: {}]   ;;  %s1125_s5 = inlined_call_operand.vmem [shape: f32[4,1], index: 5, kind: input, shape index: {}]   ;;  %s1126_s6 = inlined_call_operand.hbm [shape: f32[2,4,256], index: 6, kind: output, shape index: {}]  }
   0x1   :  { %13 = vsyncpa [#allocation3 + $0x1], 0  ;;  %s946_s21 = smov 0   ;;  %s948_s22 = smov 0  }
   0x2   :  { %s950_s23 = smov 0   ;;  %s952_s24 = smov 0  }
   0x3   :  { %s954_s25 = smov 0   ;;  %s956_s26 = smov 0  }
   0x4 LB: > { %s732_s27 = sadd.s32 4294967295, %s906_s26   ;;  %s733_s28 = sadd.s32 4294967294, %s906_s26   ;;  %s906_s26 = sphi %s956_s26, %s19_s26   ;;  %s902_s25 = sphi %s954_s25, %s1133_s25   ;;  %s898_s24 = sphi %s952_s24, %s1132_s24   ;;  %s894_s23 = sphi %s950_s23, %s1131_s23   ;;  %s890_s22 = sphi %s948_s22, %s1130_s22   ;;  %s886_s21 = sphi %s946_s21, %s1129_s21  }
   0x5   : > { %s31_s29 = sadd.s32 1, %s902_s25  ;;  %s180_s30 = sadd.s32 1, %s894_s23 }
   0x6   : > { %p33_p0 = scmp.ge.s32.totalorder %s31_s29, 2  ;;  %p190_p1 = scmp.ne.s32.totalorder %s894_s23, %s890_s22 }
   0x7   : > { %p191_p2 = scmp.eq.s32.totalorder %s732_s27, 1  ;;  %p196_p3 = scmp.ne.s32.totalorder %s890_s22, %s886_s21 }
   0x8   : > { %s1135_s29 = smov (%p33_p0, %s31_s29), 0  ;;  %p197_p5 = scmp.eq.s32.totalorder %s733_s28, 1 }
   0x9   : > { %p986_p4 = por %p191_p2, %p190_p1  ;;  %s175_s8 = ssub.s32 %s902_s25, %s1135_s29 }
   0xa   : > { %p736_p6 = scmp.ge.s32.totalorder %s906_s26, 1  ;;  %p178_p7 = scmp.eq.s32.totalorder %s175_s8, 0 }
   0xb   : > { %p993_p8 = por %p197_p5, %p196_p3  ;;  %p252_p9 = scmp.lt.s32.totalorder %s906_s26, 3 }
   0xc   : > { %s999_s10 = scalar_select %p178_p7, %s894_s23, %s180_s30  }
   0xd   : > { %p253_p10 = pnand %p736_p6, %p252_p9 }
   0xe   : > { %p295_p11 = scmp.lt.s32.totalorder (!%p253_p10), %s898_s24, 1  ;;  %s291_s12 = sand.u32 (!%p253_p10), 1, %s890_s22  }
   0xf   : > { %256 = sbr.rel (%p253_p10) target bundleno = 495 (0x1ef), region = 44  ;;  %s625_s20 = scalar_lea.sflag (!%p253_p10), [#allocation3], %s291_s12 }
  0x10   : > { %s910_s28 = smov (!%p253_p10), [#allocation2]  }
  0x11   : > { %s834_s30 = sshll.u32 (!%p253_p10), %s910_s28, 4  ;;  %s835_s30 = int_to_ptr.vmem [resolvable:$false] %s834_s30 }
  0x14   : > { %v327_v0 = vlaneseq  ;;  %v908_v1 = vmov 0.0   ;;  %v319_v2 = vld [vmem:[%s1123_s3 + $0x8] sm:$0xff]  ;;  %s296_s13 = scalar_select %p295_p11, %s898_s24, 1  ;;  %v909_v4 = vmov 0   ;;  %v321_v5 = vld [vmem:[%s1123_s3 + $0x18] sm:$0xff]  ;;  %v318_v8 = vld [vmem:[%s1123_s3] sm:$0xff] }
  0x15   : > { %442 = vmatprep.mubr.f32.mxu0 %v908_v1  ;;  %612 = vmatprep.mubr.f32.mxu1 %v908_v1  ;;  %v320_v9 = vld [vmem:[%s1123_s3 + $0x10] sm:$0xff]  ;;  %v323_v14 = vld [vmem:[%s1125_s5] sm:$0xf]  ;;  %vm373_vm0 = vcmask 1043456   ;;  %vm360_vm1 = vcmask 31744   ;;  %v315_v19 = vld [vmem:[%s1122_s2 + $0x8] sm:$0xff] }
  0x16   : > { %v328_v3 = vshrl.u32 %v327_v0, 7  ;;  %813 = vset.pattern.permute.xlu1 %v909_v4  ;;  %812 = vset.pattern.permute.xlu0 %v909_v4  ;;  %s753_s16 = sshll.u32 %s296_s13, 3  ;;  %s740_s17 = sshll.u32 %s296_s13, 1  ;;  %v314_v18 = vld [vmem:[%s1122_s2] sm:$0xff]  ;;  %v316_v20 = vld [vmem:[%s1122_s2 + $0x10] sm:$0xff]  ;;  %v317_v21 = vld [vmem:[%s1122_s2 + $0x18] sm:$0xff] }
  0x17   : > { %345 = vperm.xlu1 %813, %v319_v2   ;;  %355 = vperm.xlu0 %812, %v321_v5   ;;  %s302_s8 = scalar_lea.vmem %s1120_s0, %s753_s16  ;;  %s311_s14 = scalar_lea.vmem %s1121_s1, %s740_s17  ;;  %vm544_vm2 = vcmask 261120  }
  0x18   : > { %v329_v6 = vsub.s32 0, %v328_v3  ;;  %v333_v7 = vsub.s32 1, %v328_v3  ;;  %v325_v10 = vld [vmem:[%s311_s14] sm:$0x3]  ;;  %s737_s14 = sshll.u32 %s291_s12, 3  ;;  %s754_s13 = sshll.u32 %s898_s24, 7 }
  0x19   : > { %v324_v13 = vld [vmem:[%s302_s8] sm:$0xff]  ;;  %s293_s15 = scalar_lea.vmem [#allocation2], %s737_s14  ;;  %s639_s19 = scalar_lea.hbm %s1126_s6, %s754_s13 }
  0x1a   : > { %v330_v11 = vrot.slane %v325_v10, %v329_v6  ;;  %v334_v12 = vrot.slane %v325_v10, %v333_v7  ;;  %s641_s16 = sshll.u32 %s293_s15, 4  ;;  %s836_s24 = scalar_lea.vmem %s835_s30, 256  ;;  %s642_s16 = int_to_ptr.vmem [resolvable:$true] %s641_s16 }
  0x1b   : > { %340 = vperm.xlu1 %813, %v318_v8   ;;  %350 = vperm.xlu0 %812, %v320_v9   ;;  %s830_s27 = scalar_lea.vmem %s642_s16, 128  ;;  %p837_p1 = scmp.lt.s32.totalorder %s642_s16, %s835_s30 }
  0x1c   : > { %v335_v15 = vcombine.low %v330_v11, %v334_v12  ;;  %p831_p12 = scmp.ne.s32.totalorder %s642_s16, %s830_s27  ;;  %p838_p2 = scmp.lt.s32.totalorder %s836_s24, %s830_s27 }
  0x1e   : > { %v337_v16 = vmul.f32 %v335_v15, %v324_v13  ;;  %p832_p13 = pnand %p831_p12, %p986_p4  ;;  %p839_p3 = por %p838_p2, %p837_p1 }
  0x1f   : > { %541 = vperm.xlu0 %812, %v323_v14  }
  0x20   : > { %v359_v17 = vcombine.high %v337_v16, %v337_v16  ;;  %p833_p0 = pneg %p832_p13 }
  0x22   : > { %741 = vmatprep.subr.msk.mxu0 %vm373_vm0, %v359_v17  ;;  %p840_p5 = pnand %p839_p3, %p833_p0 }
  0x23   : > { %742 = vmatpush1.msk.msra.mxu0 %vm373_vm0, %v337_v16 }
  0x24   : > { %743 = vmatmul.mubr.msk.f32.vlgmr.msra.gmra.mxu0 %vm360_vm1, %v314_v18 }
  0x25   : > { %448 = vmatprep.mubr.f32.mxu0 %v908_v1 }
  0x28   : > { %744 = vmatmul.mubr.msk.f32.gmra.mxu0 %vm360_vm1, %v315_v19 }
  0x29   : > { %454 = vmatprep.mubr.f32.mxu0 %v908_v1 }
  0x2c   : > { %745 = vmatmul.mubr.msk.f32.gmra.mxu0 %vm360_vm1, %v316_v20 }
  0x2d   : > { %460 = vmatprep.mubr.f32.mxu0 %v908_v1 }
  0x30   : > { %746 = vmatmul.mubr.msk.f32.gmra.mxu0 %vm360_vm1, %v317_v21 }
  0x92   : > { %v346_v22 = vpop.permute.xlu1 %345  ;;  %v356_v25 = vpop.permute.xlu0 %355 }
  0x96   : > { %v341_v24 = vpop.permute.xlu1 %340  ;;  %v351_v36 = vpop.permute.xlu0 %350 }
  0xe4   : > { %v444_v23 = vpop.f32.mrf.mxu0 }
  0xe5   : > { %v1038_v28 = vadd.f32 %v444_v23, %v341_v24 }
  0xe6   : > { %v446_v26 = vpop.f32.mrf.mxu0 }
  0xe7   : > { %v1036_v27 = vadd.f32 %v446_v26, %v341_v24  ;;  %v467_v37 = vmul.f32 %v1038_v28, %v1038_v28 }
  0xe8   : > { %v450_v29 = vpop.f32.mrf.mxu0 }
  0xe9   : > { %v468_v30 = vmul.f32 %v1036_v27, %v1036_v27  ;;  %v1042_v31 = vadd.f32 %v450_v29, %v346_v22  ;;  %v475_v46 = vmul.f32 %v467_v37, %v1038_v28 }
  0xea   : > { %v452_v32 = vpop.f32.mrf.mxu0 }
  0xeb   : > { %v476_v33 = vmul.f32 %v468_v30, %v1036_v27  ;;  %v469_v34 = vmul.f32 %v1042_v31, %v1042_v31  ;;  %v1047_v35 = vadd.f32 %v452_v32, %v346_v22  ;;  %v483_v58 = vmul.f32 0.044715, %v475_v46 }
  0xec   : > { %v456_v38 = vpop.f32.mrf.mxu0 }
  0xed   : > { %v484_v39 = vmul.f32 0.044715, %v476_v33  ;;  %v477_v40 = vmul.f32 %v469_v34, %v1042_v31  ;;  %v470_v41 = vmul.f32 %v1047_v35, %v1047_v35  ;;  %v1054_v42 = vadd.f32 %v456_v38, %v351_v36 }
  0xee   : > { %v458_v43 = vpop.f32.mrf.mxu0  ;;  %v491_v6 = vadd.f32 %v483_v58, %v1038_v28 }
  0xef   : > { %v485_v44 = vmul.f32 0.044715, %v477_v40  ;;  %v478_v45 = vmul.f32 %v470_v41, %v1047_v35  ;;  %v471_v47 = vmul.f32 %v1054_v42, %v1054_v42  ;;  %v1060_v48 = vadd.f32 %v458_v43, %v351_v36 }
  0xf0   : > { %v462_v49 = vpop.f32.mrf.mxu0  ;;  %v492_v50 = vadd.f32 %v484_v39, %v1036_v27  ;;  %v499_v15 = vmul.f32 0.7978846, %v491_v6 }
  0xf1   : > { %v486_v51 = vmul.f32 0.044715, %v478_v45  ;;  %v493_v52 = vadd.f32 %v485_v44, %v1042_v31  ;;  %v479_v53 = vmul.f32 %v471_v47, %v1054_v42  ;;  %v472_v54 = vmul.f32 %v1060_v48, %v1060_v48 }
  0xf2   : > { %v463_v55 = vadd.f32 %v462_v49, %v356_v25  ;;  %v464_v56 = vpop.f32.mrf.mxu0  ;;  %v500_v62 = vmul.f32 0.7978846, %v492_v50 }
  0xf3   : > { %v465_v57 = vadd.f32 %v464_v56, %v356_v25  ;;  %v487_v59 = vmul.f32 0.044715, %v479_v53  ;;  %v480_v60 = vmul.f32 %v472_v54, %v1060_v48  ;;  %v494_v63 = vadd.f32 %v486_v51, %v1047_v35 }
  0xf4   : > { %v473_v61 = vmul.f32 %v463_v55, %v463_v55  ;;  %v501_v1 = vmul.f32 0.7978846, %v493_v52  ;;  %814 = vtanh.f32 %v500_v62 }
  0xf5   : > { %v474_v0 = vmul.f32 %v465_v57, %v465_v57  ;;  %v495_v2 = vadd.f32 %v487_v59, %v1054_v42  ;;  %v488_v3 = vmul.f32 0.044715, %v480_v60  ;;  %v502_v10 = vmul.f32 0.7978846, %v494_v63 }
  0xf6   : > { %v481_v4 = vmul.f32 %v473_v61, %v463_v55  ;;  %816 = vtanh.f32 %v501_v1 }
  0xf7   : > { %v482_v5 = vmul.f32 %v474_v0, %v465_v57  ;;  %v503_v7 = vmul.f32 0.7978846, %v495_v2  ;;  %v496_v8 = vadd.f32 %v488_v3, %v1060_v48 }
  0xf8   : > { %v489_v9 = vmul.f32 0.044715, %v481_v4 }
  0xf9   : > { %v490_v11 = vmul.f32 0.044715, %v482_v5  ;;  %v504_v12 = vmul.f32 0.7978846, %v496_v8  ;;  %818 = vtanh.f32 %v503_v7 }
  0xfa   : > { %v497_v13 = vadd.f32 %v489_v9, %v463_v55 }
  0xfb   : > { %v498_v14 = vadd.f32 %v490_v11, %v465_v57  ;;  %820 = vtanh.f32 %v504_v12 }
  0xfc   : > { %v505_v16 = vmul.f32 0.7978846, %v497_v13  ;;  %822 = vtanh.f32 %v502_v10 }
  0xfd   : > { %v506_v17 = vmul.f32 0.7978846, %v498_v14 }
  0xfe   : > { %824 = vtanh.f32 %v505_v16 }
  0xff   : > { %826 = vtanh.f32 %v506_v17 }
 0x100   : > { %828 = vtanh.f32 %v499_v15 }
 0x101   : > { %v815_v18 = vpop.eup %814 }
 0x102   : > { %v516_v39 = vadd.f32 1.0, %v815_v18 }
 0x103   : > { %v817_v19 = vpop.eup %816 }
 0x104   : > { %v517_v36 = vadd.f32 1.0, %v817_v19  ;;  %v524_v49 = vmul.f32 0.5, %v516_v39 }
 0x106   : > { %v819_v20 = vpop.eup %818  ;;  %v525_v46 = vmul.f32 0.5, %v517_v36  ;;  %v532_v54 = vmul.f32 %v524_v49, %v1036_v27 }
 0x107   : > { %v519_v29 = vadd.f32 1.0, %v819_v20 }
 0x108   : > { %v821_v21 = vpop.eup %820  ;;  %v533_v53 = vmul.f32 %v525_v46, %v1042_v31 }
 0x109   : > { %v823_v22 = vpop.eup %822  ;;  %v520_v24 = vadd.f32 1.0, %v821_v21  ;;  %v527_v40 = vmul.f32 0.5, %v519_v29 }
 0x10a   : > { %v518_v33 = vadd.f32 1.0, %v823_v22 }
 0x10b   : > { %v825_v23 = vpop.eup %824  ;;  %v528_v38 = vmul.f32 0.5, %v520_v24  ;;  %v535_v50 = vmul.f32 %v527_v40, %v1054_v42  ;;  %v542_v42 = vpop.permute.xlu0 %541 }
 0x10c   : > { %v827_v25 = vpop.eup %826  ;;  %v521_v26 = vadd.f32 1.0, %v825_v23  ;;  %v526_v44 = vmul.f32 0.5, %v518_v33 }
 0x10d   : > { %v829_v30 = vpop.eup %828  ;;  %v522_v32 = vadd.f32 1.0, %v827_v25  ;;  %v536_v47 = vmul.f32 %v528_v38, %v1060_v48  ;;  %v322_v48 = vld [vmem:[%s1124_s4] sm:$0xf] }
 0x10e   : > { %v529_v34 = vmul.f32 0.5, %v521_v26  ;;  %v515_v41 = vadd.f32 1.0, %v829_v30  ;;  %v534_v52 = vmul.f32 %v526_v44, %v1047_v35 }
 0x10f   : > { %v530_v37 = vmul.f32 0.5, %v522_v32 }
 0x110   : > { %v537_v45 = vmul.f32 %v529_v34, %v463_v55  ;;  %v523_v51 = vmul.f32 0.5, %v515_v41 }
 0x111   : > { %v538_v43 = vmul.f32 %v530_v37, %v465_v57 }
 0x112   : > { %v531_v55 = vmul.f32 %v523_v51, %v1038_v28 }
 0x113   : > { %572 = vmatprep.subr.mxu1 %v538_v43 }
 0x114   : > { %573 = vmatpush1.msra.mxu1 %v537_v45 }
 0x115   : > { %574 = vmatprep.subr.mxu1 %v536_v47 }
 0x116   : > { %575 = vmatpush1.msra.mxu1 %v535_v50 }
 0x117   : > { %576 = vmatprep.subr.mxu1 %v534_v52 }
 0x118   : > { %577 = vmatpush1.msra.mxu1 %v533_v53 }
 0x119   : > { %578 = vmatprep.subr.mxu1 %v532_v54 }
 0x11a   : > { %579 = vmatpush1.msra.mxu1 %v531_v55 }
 0x11b   : > { %747 = vmatmul.mubr.msk.f32.vlgmr.msra.gmra.mxu1 %vm544_vm2, %v322_v48 }
 0x1db   : > { %v614_v35 = vpop.f32.mrf.mxu1 }
 0x1dc   : > { %v615_v27 = vadd.f32 %v614_v35, %v542_v42 }
 0x1dd   : > { %v616_v31 = vpop.f32.mrf.mxu1 }
 0x1de   : > { %v617_v56 = vadd.f32 %v616_v31, %v542_v42 }
 0x1e0   : > { %v621_v28 = vcombine.low %v615_v27, %v617_v56 }
 0x1e2   : > { %623 = vst [vmem:[%s293_s15] sm:$0xff] %v621_v28 }
 0x1e3   : > { %843 = shalt.err (!%p840_p5)
}
 0x1e4   : > { %s844_s8 = scalar_lea.hbm %s639_s19, 128  ;;  %s848_s14 = scalar_lea.hbm %s1126_s6, 256 }
 0x1e5   : > { %p845_p6 = scmp.ne.s32.totalorder %s639_s19, %s844_s8  ;;  %p849_p10 = scmp.lt.s32.totalorder %s639_s19, %s1126_s6 }
 0x1e6   : > { %p850_p11 = scmp.lt.s32.totalorder %s848_s14, %s844_s8 }
 0x1e7   : > { %p846_p7 = pnand %p845_p6, %p986_p4 }
 0x1e8   : > { %p851_p12 = por %p850_p11, %p849_p10 }
 0x1e9   : > { %p847_p9 = pneg %p846_p7 }
 0x1eb   : > { %p852_p13 = pnand %p851_p12, %p847_p9 }
 0x1ed   : > { %855 = shalt.err (!%p852_p13)
}
 0x1ee   : > { %755 = dma.vmem_to_hbm [thread:$0]  (%p986_p4), %s642_s16, 128, %s639_s19, %s625_s20  }
 0x1ef PF: > { %p761_p0 = scmp.ge.s32.totalorder %s906_s26, 2  ;;  %s653_s18 = sand.u32 1, %s886_s21  }
 0x1f0   : > { %s654_s17 = scalar_lea.sflag [#allocation3], %s653_s18 }
 0x1f1   : > { %p758_p1 = pnand %p761_p0, %p993_p8 }
 0x1f3   : > { %p759_p2 = pneg %p758_p1 }
 0x1f5   : > { %881 = dma.done.wait (%p759_p2), %s654_s17, 128  }
 0x1f6   : > { %883 = vsyncadd (%p759_p2), %s654_s17, 4294967168  ;;  %s19_s26 = sadd.s32 1, %s906_s26   ;;  %s1129_s21 = smov %s890_s22 }
 0x1f7   : > { %p16_p3 = scmp.ge.s32.totalorder %s19_s26, 4   ;;  %s1130_s22 = smov %s894_s23 }
 0x1f8   : > { %s1131_s23 = smov %s999_s10  ;;  %s1132_s24 = smov %s902_s25 }
 0x1f9   : > { %s1133_s25 = smov %s1135_s29  ;;  %18 = sbr.rel (!%p16_p3) target bundleno = 4 (0x4), region = 82 }
 0x1fe   :  { %659 = vsyncpa [#allocation3], 1 }
 0x1ff   :  { %661 = vsyncpa [#allocation3 + $0x1], 1 }

</bundles_post_ra>
